<compile_context>
chip_gen: v5e
topology: v5e:2x2
jax: 0.10.0
libtpu: 0.0.40
codegen_flags: <defaults>
</compile_context>

<pallas_src>
import functools

import jax
import jax.numpy as jnp
from jax.experimental import pallas as pl
from jax.experimental.pallas import tpu as pltpu


def _round_up(x, m):
    return (x + m - 1) // m * m


def _vmem_capacity():
    try:
        return int(pltpu.get_tpu_info().vmem_capacity_bytes)
    except Exception:
        return 64 << 20  # conservative default (v7x per-TC VMEM)


def _pick_chunk(HW, max_chunk=2048):
    """Largest divisor of HW that is a multiple of 8 and <= max_chunk."""
    if HW <= max_chunk:
        return HW
    best = 8
    for c in range(8, max_chunk + 1, 8):
        if HW % c == 0:
            best = c
    return best


def _pick_batch_tile(B, HW, K9, Cmid, in_itemsize, budget_bytes):
    """Largest divisor of B whose per-step VMEM footprint fits the budget.

    VMEM accounting uses lane-padded widths (VMEM tiles are (8,128)); HBM
    traffic is unpadded.  Keeps >= 2 grid steps whenever B >= 2 so v7x's two
    TensorCores both get work (harmless on 1-TC v5e/v6e).
    """
    Kl = _round_up(K9, 128)
    Cl = _round_up(Cmid, 128)
    per_batch = HW * (2 * Kl * in_itemsize + 2 * Cl * 4) + (1 << 20)
    bt = 1
    for cand in range(1, B + 1):
        if B % cand:
            continue
        if cand * per_batch > budget_bytes:
            continue
        if B >= 2 and (B // cand) < 2:
            continue
        bt = cand
    return bt, per_batch


def _make_kernel(Bt, HW, Cmid, eps, chunk):
    n_chunks = HW // chunk

    def kernel(p_ref, w_ref, gb_ref, pmat_ref, o_ref):
        # p_ref   : (Bt*HW, K9)     im2col patches (unpadded K), bf16/f32
        # w_ref   : (K9, Cmid)      conv weights, HWIO flattened
        # gb_ref  : (2, Cmid)       row0 = gamma, row1 = beta (f32)
        # pmat_ref: (Cmid, Cmid)    block-diag group-average matrix / (gsz*HW)
        # o_ref   : (Bt*HW, Cmid)   f32 output; also used as the conv accumulator
        w = w_ref[...]
        gamma = gb_ref[0:1, :]
        beta = gb_ref[1:2, :]

        for b in range(Bt):                      # static, small
            base = b * HW

            # ---- pass 1: conv (one MXU matmul per chunk) into o_ref + stats --
            def conv_chunk(c, carry):
                s1, s2 = carry
                r0 = pl.multiple_of(base + c * chunk, 8)
                a = jnp.dot(p_ref[pl.ds(r0, chunk), :], w,
                            preferred_element_type=jnp.float32)   # (chunk, Cmid)
                o_ref[pl.ds(r0, chunk), :] = a
                return (s1 + jnp.sum(a, axis=0, keepdims=True),
                        s2 + jnp.sum(a * a, axis=0, keepdims=True))

            z = jnp.zeros((1, Cmid), jnp.float32)
            s1, s2 = jax.lax.fori_loop(0, n_chunks, conv_chunk, (z, z))

            # ---- GroupNorm stats: one tiny block-diagonal group-average dot --
            # NOTE: single-pass E[x^2]-E[x]^2 in f32 (see review precision note).
            stats = jnp.concatenate([s1, s2], axis=0)              # (2, Cmid)
            m = jnp.dot(stats, pmat_ref[...],
                        preferred_element_type=jnp.float32)        # (2, Cmid)
            mean = m[0:1, :]
            var = m[1:2, :] - mean * mean
            inv = jax.lax.rsqrt(var + jnp.float32(eps))
            scale = inv * gamma                                    # gamma folded
            shift = beta - mean * scale                            # beta folded

            # ---- pass 2: normalize + affine + ReLU in place -----------------
            def norm_chunk(c, _):
                r0 = pl.multiple_of(base + c * chunk, 8)
                y = o_ref[pl.ds(r0, chunk), :]
                o_ref[pl.ds(r0, chunk), :] = jnp.maximum(y * scale + shift, 0.0)
                return 0

            jax.lax.fori_loop(0, n_chunks, norm_chunk, 0)

    return kernel


@functools.partial(jax.jit, static_argnames=("eps", "use_bf16_matmul"))
def double_conv(x_nchw, w_hwio, gamma, beta, eps=1e-5, *, use_bf16_matmul=True):
    """DoubleConv forward. x_nchw: (B, Cin, H, W); w_hwio: (3, 3, Cin, Cmid)."""
    B, Cin, H, W = x_nchw.shape
    kh, kw, wcin, Cmid = w_hwio.shape
    assert (kh, kw, wcin) == (3, 3, Cin)
    assert Cmid % 16 == 0, "GroupNorm(mid//16, mid) requires mid % 16 == 0"
    gsz = 16
    HW = H * W
    assert HW % 8 == 0, "H*W must be a multiple of 8 (sublane alignment)"
    K9 = 9 * Cin

    in_dtype = jnp.bfloat16 if use_bf16_matmul else jnp.float32
    in_itemsize = jnp.dtype(in_dtype).itemsize

    # ---- preprocessing (XLA-fused): NCHW->NHWC, halo pad, im2col (K unpadded)
    x = jnp.transpose(x_nchw, (0, 2, 3, 1))                        # (B,H,W,Cin)
    xp = jnp.pad(x, ((0, 0), (1, 1), (1, 1), (0, 0)))              # spatial halo
    patches = jnp.concatenate(
        [xp[:, ky:ky + H, kx:kx + W, :] for ky in range(3) for kx in range(3)],
        axis=-1).reshape(B * HW, K9).astype(in_dtype)              # (B*HW, 9*Cin)

    w2 = w_hwio.reshape(K9, Cmid).astype(in_dtype)                 # (ky,kx,ci) rows
    gb = jnp.stack([gamma, beta], axis=0).astype(jnp.float32)      # (2, Cmid)

    gid = jnp.arange(Cmid, dtype=jnp.int32) // gsz
    pmat = (gid[:, None] == gid[None, :]).astype(jnp.float32) / float(gsz * HW)

    # ---- generation-aware tiling -----------------------------------------
    cap = _vmem_capacity()                      # 128 MiB (v5e/v6e) / 64 MiB (v7x)
    budget = min(40 << 20, cap // 3)
    Bt, per_batch = _pick_batch_tile(B, HW, K9, Cmid, in_itemsize, budget)
    chunk = _pick_chunk(HW)
    grid = (B // Bt,)

    Kl = _round_up(K9, 128)
    Cl = _round_up(Cmid, 128)
    step_bytes = (Bt * HW * (2 * Kl * in_itemsize + 2 * Cl * 4)
                  + 2 * Kl * Cl * 4 + (4 << 20))
    vmem_limit = int(min(cap * 3 // 4, max(32 << 20, 2 * step_bytes)))

    kernel = _make_kernel(Bt, HW, Cmid, eps, chunk)

    out = pl.pallas_call(
        kernel,
        out_shape=jax.ShapeDtypeStruct((B * HW, Cmid), jnp.float32),
        grid_spec=pltpu.PrefetchScalarGridSpec(
            num_scalar_prefetch=0,
            grid=grid,
            in_specs=[
                pl.BlockSpec((Bt * HW, K9), lambda b: (b, 0)),
                pl.BlockSpec((K9, Cmid), lambda b: (0, 0)),
                pl.BlockSpec((2, Cmid), lambda b: (0, 0)),
                pl.BlockSpec((Cmid, Cmid), lambda b: (0, 0)),
            ],
            out_specs=pl.BlockSpec((Bt * HW, Cmid), lambda b: (b, 0)),
        ),
        compiler_params=pltpu.CompilerParams(
            dimension_semantics=("parallel",),
            vmem_limit_bytes=vmem_limit,
        ),
    )(patches, w2, gb, pmat)

    # ---- postprocess: back to NCHW (module contract) ----------------------
    out = out.reshape(B, H, W, Cmid)
    return jnp.transpose(out, (0, 3, 1, 2))


def _reference(x_nchw, w_hwio, gamma, beta, eps=1e-5):
    """Pure-JAX reference (conv -> GroupNorm -> ReLU) for correctness check."""
    x = jnp.transpose(x_nchw, (0, 2, 3, 1))
    y = jax.lax.conv_general_dilated(
        x, w_hwio, window_strides=(1, 1), padding="SAME",
        dimension_numbers=("NHWC", "HWIO", "NHWC"),
        precision=jax.lax.Precision.HIGHEST)
    y = jnp.transpose(y, (0, 3, 1, 2))
    B, C, H, W = y.shape
    G = C // 16
    yg = y.reshape(B, G, C // G, H, W)
    mean = jnp.mean(yg, axis=(2, 3, 4), keepdims=True)
    var = jnp.mean((yg - mean) ** 2, axis=(2, 3, 4), keepdims=True)
    yn = ((yg - mean) * jax.lax.rsqrt(var + eps)).reshape(B, C, H, W)
    yn = yn * gamma.reshape(1, C, 1, 1) + beta.reshape(1, C, 1, 1)
    return jnp.maximum(yn, 0.0)


if __name__ == "__main__":
    # Shapes consistent with the module: in_channels=4, out=mid=32
    # (mid_channels must be a multiple of 16 for GroupNorm(mid//16, mid)).
    B, Cin, H, W = 2, 4, 16, 16
    Cmid = 32

    key = jax.random.PRNGKey(0)
    kx_, kw_, kg_, kb_ = jax.random.split(key, 4)

    x = jax.random.normal(kx_, (B, Cin, H, W), dtype=jnp.float32)
    w = jax.random.normal(kw_, (3, 3, Cin, Cmid), dtype=jnp.float32) * (
        2.0 / (9 * Cin)) ** 0.5
    gamma = 1.0 + 0.1 * jax.random.normal(kg_, (Cmid,), dtype=jnp.float32)
    beta = 0.1 * jax.random.normal(kb_, (Cmid,), dtype=jnp.float32)

    ref = jax.block_until_ready(_reference(x, w, gamma, beta))

    # f32 matmul path: tight check against the f32 reference.
    out_f32 = jax.block_until_ready(
        double_conv(x, w, gamma, beta, use_bf16_matmul=False))
    assert out_f32.shape == (B, Cmid, H, W)
    err_f32 = float(jnp.max(jnp.abs(out_f32 - ref)))
    assert jnp.allclose(out_f32, ref, atol=1e-3, rtol=1e-3), err_f32

    # default bf16-matmul path (perf): expected small dtype deviation.
    out_bf16 = jax.block_until_ready(double_conv(x, w, gamma, beta))
    assert out_bf16.shape == (B, Cmid, H, W)
    err_bf16 = float(jnp.max(jnp.abs(out_bf16 - ref)))
    assert jnp.allclose(out_bf16, ref, atol=6e-2, rtol=6e-2), err_bf16

    print("KERNEL_OK")
</pallas_src>

<mosaic_0001>
module attributes {stable_mosaic.version = 11 : i64} {
  func.func @kernel(%arg0: i32, %arg1: memref<256x36xf32, #tpu.memory_space<vmem>>, %arg2: memref<36x32xf32, #tpu.memory_space<vmem>>, %arg3: memref<2x32xf32, #tpu.memory_space<vmem>>, %arg4: memref<32x32xf32, #tpu.memory_space<vmem>>, %arg5: memref<256x32xf32, #tpu.memory_space<vmem>>) attributes {dimension_semantics = [#tpu.dimension_semantics<parallel>], iteration_bounds = array<i64: 2>, scalar_prefetch = 0 : i64, scratch_operands = 0 : i64, tpu.core_type = #tpu.core_type<tc>, window_params = [{transform_indices = @transform_0, window_bounds = array<i64: 256, 36>}, {pipeline_mode = #tpu.pipeline_mode<synchronous>, transform_indices = @transform_1, window_bounds = array<i64: 36, 32>}, {pipeline_mode = #tpu.pipeline_mode<synchronous>, transform_indices = @transform_2, window_bounds = array<i64: 2, 32>}, {pipeline_mode = #tpu.pipeline_mode<synchronous>, transform_indices = @transform_3, window_bounds = array<i64: 32, 32>}, {transform_indices = @transform_4, window_bounds = array<i64: 256, 32>}]} {
    %c0 = arith.constant 0 : index
    %c0_0 = arith.constant 0 : index
    %0 = vector.load %arg2[%c0, %c0_0] : memref<36x32xf32, #tpu.memory_space<vmem>>, vector<36x32xf32>
    %c0_1 = arith.constant 0 : index
    %c0_2 = arith.constant 0 : index
    %1 = vector.load %arg3[%c0_1, %c0_2] : memref<2x32xf32, #tpu.memory_space<vmem>>, vector<1x32xf32>
    %c1 = arith.constant 1 : index
    %c0_3 = arith.constant 0 : index
    %2 = vector.load %arg3[%c1, %c0_3] : memref<2x32xf32, #tpu.memory_space<vmem>>, vector<1x32xf32>
    %cst = arith.constant 0.000000e+00 : f32
    %3 = vector.broadcast %cst : f32 to vector<1x32xf32>
    %c0_i32 = arith.constant 0 : i32
    %c256_i32 = arith.constant 256 : i32
    %4 = arith.muli %c0_i32, %c256_i32 : i32
    %c0_i32_4 = arith.constant 0 : i32
    %5 = arith.addi %c0_i32_4, %4 : i32
    %6 = tpu.assume_multiple %5, 8 : i32
    %7 = arith.index_cast %6 : i32 to index
    %c0_5 = arith.constant 0 : index
    %8 = vector.load %arg1[%7, %c0_5] : memref<256x36xf32, #tpu.memory_space<vmem>>, vector<256x36xf32>
    %cst_6 = arith.constant dense<0.000000e+00> : vector<256x32xf32>
    %9 = tpu.matmul %8, %0, %cst_6 {dimension_numbers = #tpu.dot_dimension_numbers<[1], [0], [0], [1], [0, 0, 1, 1], [], []>} : vector<256x36xf32>, vector<36x32xf32>, vector<256x32xf32> -> vector<256x32xf32>
    %10 = arith.index_cast %6 : i32 to index
    %c0_7 = arith.constant 0 : index
    %11 = vector.load %arg5[%10, %c0_7] : memref<256x32xf32, #tpu.memory_space<vmem>>, vector<256x32xf32>
    tpu.vector_store %arg5[%10, %c0_7], %9 {strides = array<i32>} : memref<256x32xf32, #tpu.memory_space<vmem>>, vector<256x32xf32>,
    %cst_8 = arith.constant dense<0.000000e+00> : vector<32xf32>
    %12 = vector.multi_reduction <add>, %9, %cst_8 [0] : vector<256x32xf32> to vector<32xf32>
    %13 = vector.shape_cast %12 : vector<32xf32> to vector<1x32xf32>
    %14 = arith.addf %3, %13 : vector<1x32xf32>
    %15 = arith.mulf %9, %9 : vector<256x32xf32>
    %cst_9 = arith.constant dense<0.000000e+00> : vector<32xf32>
    %16 = vector.multi_reduction <add>, %15, %cst_9 [0] : vector<256x32xf32> to vector<32xf32>
    %17 = vector.shape_cast %16 : vector<32xf32> to vector<1x32xf32>
    %18 = arith.addf %3, %17 : vector<1x32xf32>
    %c1_i32 = arith.constant 1 : i32
    %19 = tpu.concatenate %14, %18 in 0 : vector<1x32xf32>, vector<1x32xf32> -> vector<2x32xf32>
    %c0_10 = arith.constant 0 : index
    %c0_11 = arith.constant 0 : index
    %20 = vector.load %arg4[%c0_10, %c0_11] : memref<32x32xf32, #tpu.memory_space<vmem>>, vector<32x32xf32>
    %cst_12 = arith.constant dense<0.000000e+00> : vector<2x32xf32>
    %21 = tpu.matmul %19, %20, %cst_12 {dimension_numbers = #tpu.dot_dimension_numbers<[1], [0], [0], [1], [0, 0, 1, 1], [], []>} : vector<2x32xf32>, vector<32x32xf32>, vector<2x32xf32> -> vector<2x32xf32>
    %22 = vector.extract_strided_slice %21 {offsets = [0, 0], sizes = [1, 32], strides = [1, 1]} : vector<2x32xf32> to vector<1x32xf32>
    %23 = vector.extract_strided_slice %21 {offsets = [1, 0], sizes = [1, 32], strides = [1, 1]} : vector<2x32xf32> to vector<1x32xf32>
    %24 = arith.mulf %22, %22 : vector<1x32xf32>
    %25 = arith.subf %23, %24 : vector<1x32xf32>
    %cst_13 = arith.constant 9.99999974E-6 : f32
    %26 = vector.broadcast %cst_13 : f32 to vector<1x32xf32>
    %27 = arith.addf %25, %26 : vector<1x32xf32>
    %28 = math.rsqrt %27 : vector<1x32xf32>
    %29 = arith.mulf %28, %1 : vector<1x32xf32>
    %30 = arith.mulf %22, %29 : vector<1x32xf32>
    %31 = arith.subf %2, %30 : vector<1x32xf32>
    %c0_i32_14 = arith.constant 0 : i32
    %c256_i32_15 = arith.constant 256 : i32
    %32 = arith.muli %c0_i32_14, %c256_i32_15 : i32
    %c0_i32_16 = arith.constant 0 : i32
    %33 = arith.addi %c0_i32_16, %32 : i32
    %34 = tpu.assume_multiple %33, 8 : i32
    %35 = arith.index_cast %34 : i32 to index
    %c0_17 = arith.constant 0 : index
    %36 = vector.load %arg5[%35, %c0_17] : memref<256x32xf32, #tpu.memory_space<vmem>>, vector<256x32xf32>
    %37 = vector.broadcast %29 : vector<1x32xf32> to vector<256x32xf32>
    %38 = arith.mulf %36, %37 : vector<256x32xf32>
    %39 = vector.broadcast %31 : vector<1x32xf32> to vector<256x32xf32>
    %40 = arith.addf %38, %39 : vector<256x32xf32>
    %cst_18 = arith.constant 0.000000e+00 : f32
    %41 = vector.broadcast %cst_18 : f32 to vector<256x32xf32>
    %42 = arith.maximumf %40, %41 : vector<256x32xf32>
    %43 = arith.index_cast %34 : i32 to index
    %c0_19 = arith.constant 0 : index
    %44 = vector.load %arg5[%43, %c0_19] : memref<256x32xf32, #tpu.memory_space<vmem>>, vector<256x32xf32>
    tpu.vector_store %arg5[%43, %c0_19], %42 {strides = array<i32>} : memref<256x32xf32, #tpu.memory_space<vmem>>, vector<256x32xf32>,
    %c1_i32_20 = arith.constant 1 : i32
    return
  }
  func.func @transform_0(%arg0: i32) -> (i32, i32) {
    %c0_i32 = arith.constant 0 : i32
    %c0_i32_0 = arith.constant 0 : i32
    return %arg0, %c0_i32 : i32, i32
  }
  func.func @transform_1(%arg0: i32) -> (i32, i32) {
    %c0_i32 = arith.constant 0 : i32
    %c0_i32_0 = arith.constant 0 : i32
    %c0_i32_1 = arith.constant 0 : i32
    return %c0_i32, %c0_i32_0 : i32, i32
  }
  func.func @transform_2(%arg0: i32) -> (i32, i32) {
    %c0_i32 = arith.constant 0 : i32
    %c0_i32_0 = arith.constant 0 : i32
    %c0_i32_1 = arith.constant 0 : i32
    return %c0_i32, %c0_i32_0 : i32, i32
  }
  func.func @transform_3(%arg0: i32) -> (i32, i32) {
    %c0_i32 = arith.constant 0 : i32
    %c0_i32_0 = arith.constant 0 : i32
    %c0_i32_1 = arith.constant 0 : i32
    return %c0_i32, %c0_i32_0 : i32, i32
  }
  func.func @transform_4(%arg0: i32) -> (i32, i32) {
    %c0_i32 = arith.constant 0 : i32
    %c0_i32_0 = arith.constant 0 : i32
    return %arg0, %c0_i32 : i32, i32
  }
}

</mosaic_0001>

<bundles_post_ra>
// kernel: double_conv.1
= control target key start
LH: loop header
LB: loop body
LE: loop exit
PB: predicated region body
PF: predicated region fallthrough
CT: control target
= control target key end

     0   :  { %9 = vsyncpa [#allocation3], 0  ;;  %s1768_s0 = inlined_call_operand.vmem [shape: f32[512,36], index: 0, kind: input, shape index: {}]   ;;  %s1769_s1 = inlined_call_operand.vmem [shape: f32[36,32], index: 1, kind: input, shape index: {}]   ;;  %s1770_s2 = inlined_call_operand.vmem [shape: f32[2,32], index: 2, kind: input, shape index: {}]   ;;  %s1771_s3 = inlined_call_operand.vmem [shape: f32[32,32], index: 3, kind: input, shape index: {}]   ;;  %s1772_s4 = inlined_call_operand.hbm [shape: f32[512,32], index: 4, kind: output, shape index: {}]  }
   0x1   :  { %11 = vsyncpa [#allocation3 + $0x1], 0  ;;  %s1147_s15 = smov 0   ;;  %s1149_s16 = smov 0  }
   0x2   :  { %s1151_s17 = smov 0   ;;  %s1153_s18 = smov 0  }
   0x3 LB: > { %s1168_s19 = sadd.s32 4294967295, %s1118_s18   ;;  %s951_s20 = sadd.s32 4294967294, %s1118_s18   ;;  %s1118_s18 = sphi %s1153_s18, %s1778_s18   ;;  %s1114_s17 = sphi %s1151_s17, %s1777_s17   ;;  %s1110_s16 = sphi %s1149_s16, %s1776_s16   ;;  %s1106_s15 = sphi %s1147_s15, %s1775_s15  }
   0x4   : > { %s1172_s21 = sadd.s32 1, %s1118_s18   ;;  %s113_s22 = sadd.s32 1, %s1114_s17 }
   0x5   : > { %s110_s23 = ssub.s32 %s1118_s18, %s1172_s21  ;;  %p123_p0 = scmp.ne.s32.totalorder %s1114_s17, %s1110_s16 }
   0x6   : > { %p111_p1 = scmp.eq.s32.totalorder %s110_s23, 0  ;;  %p124_p2 = scmp.eq.s32.totalorder %s1168_s19, 1 }
   0x7   : > { %p129_p3 = scmp.ne.s32.totalorder %s1110_s16, %s1106_s15  ;;  %p130_p4 = scmp.eq.s32.totalorder %s951_s20, 1 }
   0x8   : > { %s1183_s24 = scalar_select %p111_p1, %s1114_s17, %s113_s22  }
   0x9   : > { %p1185_p5 = por %p124_p2, %p123_p0  ;;  %p1189_p6 = por %p130_p4, %p129_p3 }
   0xa   : > { %p954_p7 = scmp.ge.s32.totalorder %s1118_s18, 1  ;;  %p166_p8 = scmp.lt.s32.totalorder %s1118_s18, 3 }
   0xc   : > { %p167_p9 = pnand %p954_p7, %p166_p8 }
   0xd   : > { %s956_s5 = sshll.u32 (!%p167_p9), %s1168_s19, 5  ;;  %s189_s22 = sand.u32 (!%p167_p9), 1, %s1110_s16  }
   0xe   : > { %170 = sbr.rel (%p167_p9) target bundleno = 478 (0x1de), region = 36  ;;  %p193_p10 = scmp.lt.s32.totalorder (!%p167_p9), %s956_s5, 63 }
   0xf   : > { %s955_s23 = sshll.u32 (!%p167_p9), %s189_s22, 8  ;;  %s997_s14 = sshll.u32 (!%p167_p9), %s1168_s19, 8 }
  0x10   : > { %s1283_s27 = scalar_lea.vmem (!%p167_p9), [#allocation2], %s955_s23  ;;  %s885_s23 = scalar_lea.hbm (!%p167_p9), %s1772_s4, %s997_s14 }
  0x11   : > { %s886_s28 = sshll.u32 (!%p167_p9), %s1283_s27, 4  ;;  %s888_s29 = sshll.u32 (!%p167_p9), %s885_s23, 4  ;;  %s887_s28 = int_to_ptr.vmem [resolvable:$true] %s886_s28  ;;  %s889_s29 = int_to_ptr.hbm [resolvable:$true] %s888_s29 }
  0x12   : > { %s874_s30 = scalar_lea.sflag (!%p167_p9), [#allocation3], %s189_s22  ;;  %s1076_s9 = scalar_lea.hbm (!%p167_p9), %s1772_s4, 512 }
  0x13   : > { %v203_v0 = vld [vmem:[%s1769_s1 + $0x20] sm:$0xf]  ;;  %vm335_vm0 = vcmask 1043456   ;;  %v202_v1 = vld [vmem:[%s1769_s1 + $0x18] sm:$0xff]  ;;  %v201_v2 = vld [vmem:[%s1769_s1 + $0x10] sm:$0xff]  ;;  %s1780_s5 = smov (!%p193_p10, %s956_s5), 63 }
  0x14   : > { %958 = vmatpush.msk.msra.mxu0 %vm335_vm0, %v203_v0  ;;  %999 = vmatpush.msk.msra.mxu2 %vm335_vm0, %v203_v0  ;;  %v200_v3 = vld [vmem:[%s1769_s1 + $0x8] sm:$0xff]  ;;  %s957_s10 = sshll.u32 %s1780_s5, 3  ;;  %v199_v4 = vld [vmem:[%s1769_s1] sm:$0xff]  ;;  %vm238_vm1 = vcmask 293888   ;;  %vm452_vm2 = vcmask 261120   ;;  %vm657_vm3 = vcmask 1040384  }
  0x15   : > { %998 = vmatpush.msk.msra.mxu1 %vm335_vm0, %v203_v0  ;;  %1000 = vmatpush.msk.msra.mxu3 %vm335_vm0, %v203_v0  ;;  %s1214_s20 = scalar_lea.vmem %s1768_s0, %s957_s10  ;;  %s1070_s5 = sshra.s32 %s889_s29, 4  ;;  %s1071_s5 = int_to_ptr.hbm [resolvable:$true] %s1070_s5 }
  0x16   : > { %351 = vmatpush.msra.mxu0 %v202_v1  ;;  %1002 = vmatpush.msra.mxu2 %v202_v1  ;;  %v206_v5 = vld [vmem:[%s1214_s20] sm:$0xff]  ;;  %v220_v6 = vld [vmem:[%s1214_s20 + $0x70] sm:$0xff]  ;;  %v229_v8 = vld [vmem:[%s1214_s20 + $0xb8] sm:$0xff]  ;;  %s1072_s6 = scalar_lea.hbm %s1071_s5, 256  ;;  %p1077_p0 = scmp.lt.s32.totalorder %s1071_s5, %s1772_s4 }
  0x17   : > { %1001 = vmatpush.msra.mxu1 %v202_v1  ;;  %1003 = vmatpush.msra.mxu3 %v202_v1  ;;  %v214_v7 = vld [vmem:[%s1214_s20 + $0x40] sm:$0xff]  ;;  %v207_v9 = vld [vmem:[%s1214_s20 + $0x8] sm:$0xff]  ;;  %v221_v10 = vld [vmem:[%s1214_s20 + $0x78] sm:$0xff]  ;;  %p1073_p11 = scmp.ne.s32.totalorder %s1071_s5, %s1072_s6  ;;  %p1078_p1 = scmp.lt.s32.totalorder %s1076_s9, %s1072_s6 }
  0x18   : > { %352 = vmatpush.msra.mxu0 %v201_v2  ;;  %1005 = vmatpush.msra.mxu2 %v201_v2  ;;  %v215_v11 = vld [vmem:[%s1214_s20 + $0x48] sm:$0xff]  ;;  %v230_v12 = vld [vmem:[%s1214_s20 + $0xc0] sm:$0xff]  ;;  %v208_v13 = vld [vmem:[%s1214_s20 + $0x10] sm:$0xff] }
  0x19   : > { %1004 = vmatpush.msra.mxu1 %v201_v2  ;;  %1006 = vmatpush.msra.mxu3 %v201_v2  ;;  %v222_v14 = vld [vmem:[%s1214_s20 + $0x80] sm:$0xff]  ;;  %v216_v15 = vld [vmem:[%s1214_s20 + $0x50] sm:$0xff]  ;;  %v231_v16 = vld [vmem:[%s1214_s20 + $0xc8] sm:$0xff]  ;;  %p1074_p12 = pnand %p1073_p11, %p1185_p5  ;;  %p1079_p2 = por %p1078_p1, %p1077_p0 }
  0x1a   : > { %353 = vmatpush.msra.mxu0 %v200_v3  ;;  %1008 = vmatpush.msra.mxu2 %v200_v3  ;;  %v209_v17 = vld [vmem:[%s1214_s20 + $0x18] sm:$0xff]  ;;  %v223_v18 = vld [vmem:[%s1214_s20 + $0x88] sm:$0xff]  ;;  %v232_v20 = vld [vmem:[%s1214_s20 + $0xd0] sm:$0xff] }
  0x1b   : > { %1007 = vmatpush.msra.mxu1 %v200_v3  ;;  %1009 = vmatpush.msra.mxu3 %v200_v3  ;;  %v217_v19 = vld [vmem:[%s1214_s20 + $0x58] sm:$0xff]  ;;  %v210_v21 = vld [vmem:[%s1214_s20 + $0x20] sm:$0xff]  ;;  %v224_v22 = vld [vmem:[%s1214_s20 + $0x90] sm:$0xff]  ;;  %p1075_p13 = pneg %p1074_p12 }
  0x1c   : > { %354 = vmatpush.msra.mxu0 %v199_v4  ;;  %1011 = vmatpush.msra.mxu2 %v199_v4  ;;  %v218_v23 = vld [vmem:[%s1214_s20 + $0x60] sm:$0xff]  ;;  %v233_v24 = vld [vmem:[%s1214_s20 + $0xd8] sm:$0xff]  ;;  %v211_v25 = vld [vmem:[%s1214_s20 + $0x28] sm:$0xff] }
  0x1d   : > { %959 = vmatmul.msk.f32.vlgmr.msra.gmra.mxu0 %vm238_vm1, %v206_v5  ;;  %973 = vmatmul.msk.f32.vlgmr.msra.gmra.mxu2 %vm238_vm1, %v220_v6  ;;  %v225_v26 = vld [vmem:[%s1214_s20 + $0x98] sm:$0xff]  ;;  %v219_v27 = vld [vmem:[%s1214_s20 + $0x68] sm:$0xff]  ;;  %v234_v28 = vld [vmem:[%s1214_s20 + $0xe0] sm:$0xff]  ;;  %p1080_p3 = pnand %p1079_p2, %p1075_p13 }
  0x1e   : > { %1010 = vmatpush.msra.mxu1 %v199_v4  ;;  %1012 = vmatpush.msra.mxu3 %v199_v4  ;;  %v212_v29 = vld [vmem:[%s1214_s20 + $0x30] sm:$0xff]  ;;  %v226_v30 = vld [vmem:[%s1214_s20 + $0xa0] sm:$0xff]  ;;  %v235_v31 = vld [vmem:[%s1214_s20 + $0xe8] sm:$0xff] }
  0x1f   : > { %967 = vmatmul.msk.f32.vlgmr.msra.gmra.mxu1 %vm238_vm1, %v214_v7  ;;  %982 = vmatmul.msk.f32.vlgmr.msra.gmra.mxu3 %vm238_vm1, %v229_v8  ;;  %v213_v32 = vld [vmem:[%s1214_s20 + $0x38] sm:$0xff]  ;;  %v227_v33 = vld [vmem:[%s1214_s20 + $0xa8] sm:$0xff]  ;;  %v236_v34 = vld [vmem:[%s1214_s20 + $0xf0] sm:$0xff] }
  0x20   : > { %v228_v35 = vld [vmem:[%s1214_s20 + $0xb0] sm:$0xff]  ;;  %v237_v36 = vld [vmem:[%s1214_s20 + $0xf8] sm:$0xff] }
  0x25   : > { %960 = vmatmul.msk.f32.gmra.mxu0 %vm238_vm1, %v207_v9  ;;  %974 = vmatmul.msk.f32.gmra.mxu2 %vm238_vm1, %v221_v10 }
  0x27   : > { %968 = vmatmul.msk.f32.gmra.mxu1 %vm238_vm1, %v215_v11  ;;  %983 = vmatmul.msk.f32.gmra.mxu3 %vm238_vm1, %v230_v12 }
  0x2d   : > { %961 = vmatmul.msk.f32.gmra.mxu0 %vm238_vm1, %v208_v13  ;;  %975 = vmatmul.msk.f32.gmra.mxu2 %vm238_vm1, %v222_v14 }
  0x2f   : > { %969 = vmatmul.msk.f32.gmra.mxu1 %vm238_vm1, %v216_v15  ;;  %984 = vmatmul.msk.f32.gmra.mxu3 %vm238_vm1, %v231_v16 }
  0x35   : > { %962 = vmatmul.msk.f32.gmra.mxu0 %vm238_vm1, %v209_v17  ;;  %976 = vmatmul.msk.f32.gmra.mxu2 %vm238_vm1, %v223_v18 }
  0x37   : > { %970 = vmatmul.msk.f32.gmra.mxu1 %vm238_vm1, %v217_v19  ;;  %985 = vmatmul.msk.f32.gmra.mxu3 %vm238_vm1, %v232_v20 }
  0x3d   : > { %963 = vmatmul.msk.f32.gmra.mxu0 %vm238_vm1, %v210_v21  ;;  %977 = vmatmul.msk.f32.gmra.mxu2 %vm238_vm1, %v224_v22 }
  0x3f   : > { %971 = vmatmul.msk.f32.gmra.mxu1 %vm238_vm1, %v218_v23  ;;  %986 = vmatmul.msk.f32.gmra.mxu3 %vm238_vm1, %v233_v24 }
  0x45   : > { %964 = vmatmul.msk.f32.gmra.mxu0 %vm238_vm1, %v211_v25  ;;  %978 = vmatmul.msk.f32.gmra.mxu2 %vm238_vm1, %v225_v26 }
  0x47   : > { %972 = vmatmul.msk.f32.gmra.mxu1 %vm238_vm1, %v219_v27  ;;  %987 = vmatmul.msk.f32.gmra.mxu3 %vm238_vm1, %v234_v28  ;;  %v662_v28 = vld [vmem:[%s1771_s3 + $0x18] sm:$0xff] }
  0x48   : > { %678 = vmatpush.msrb.mxu1 %v662_v28 }
  0x4d   : > { %965 = vmatmul.msk.f32.gmra.mxu0 %vm238_vm1, %v212_v29  ;;  %979 = vmatmul.msk.f32.gmra.mxu2 %vm238_vm1, %v226_v30 }
  0x4f   : > { %988 = vmatmul.msk.f32.gmra.mxu3 %vm238_vm1, %v235_v31 }
  0x55   : > { %966 = vmatmul.msk.f32.gmra.mxu0 %vm238_vm1, %v213_v32  ;;  %980 = vmatmul.msk.f32.gmra.mxu2 %vm238_vm1, %v227_v33 }
  0x57   : > { %989 = vmatmul.msk.f32.gmra.mxu3 %vm238_vm1, %v236_v34 }
  0x5d   : > { %981 = vmatmul.msk.f32.gmra.mxu2 %vm238_vm1, %v228_v35 }
  0x5f   : > { %990 = vmatmul.msk.f32.gmra.mxu3 %vm238_vm1, %v237_v36 }
  0x9a   : > { %v356_v37 = vpop.f32.mrf.mxu0 }
  0x9b   : > { %453 = vst.msk [vmem:[%s1283_s27] sm:$0xff] %vm452_vm2, %v356_v37  ;;  %v555_v60 = vmul.f32 %v356_v37, %v356_v37  ;;  %v485_v63 = vsel %vm452_vm2, %v356_v37, 0.0 }
  0x9c   : > { %v1287_v38 = vpop.f32.mrf.mxu1 }
  0x9d   : > { %461 = vst.msk [vmem:[%s1283_s27 + $0x40] sm:$0xff] %vm452_vm2, %v1287_v38  ;;  %v587_v5 = vsel %vm452_vm2, %v555_v60, 0.0  ;;  %v563_v34 = vmul.f32 %v1287_v38, %v1287_v38 }
  0x9f   : > { %v602_v60 = vsel %vm452_vm2, %v563_v34, 0.0 }
  0xa0   : > { %v1292_v39 = vpop.f32.mrf.mxu2 }
  0xa1   : > { %467 = vst.msk [vmem:[%s1283_s27 + $0x70] sm:$0xff] %vm452_vm2, %v1292_v39 }
  0xa2   : > { %v359_v40 = vpop.f32.mrf.mxu0  ;;  %v1297_v41 = vpop.f32.mrf.mxu3 }
  0xa3   : > { %454 = vst.msk [vmem:[%s1283_s27 + $0x8] sm:$0xff] %vm452_vm2, %v359_v40  ;;  %v556_v58 = vmul.f32 %v359_v40, %v359_v40  ;;  %v486_v61 = vsel %vm452_vm2, %v359_v40, 0.0 }
  0xa4   : > { %v1301_v42 = vpop.f32.mrf.mxu1  ;;  %476 = vst.msk [vmem:[%s1283_s27 + $0xb8] sm:$0xff] %vm452_vm2, %v1297_v41  ;;  %v487_v3 = vadd.f32 %v486_v61, %v485_v63 }
  0xa5   : > { %462 = vst.msk [vmem:[%s1283_s27 + $0x48] sm:$0xff] %vm452_vm2, %v1301_v42  ;;  %v588_v0 = vsel %vm452_vm2, %v556_v58, 0.0  ;;  %v502_v61 = vsel %vm452_vm2, %v1301_v42, 0.0 }
  0xa6   : > { %v589_v9 = vadd.f32 %v588_v0, %v587_v5 }
  0xa8   : > { %v1309_v43 = vpop.f32.mrf.mxu2 }
  0xa9   : > { %468 = vst.msk [vmem:[%s1283_s27 + $0x78] sm:$0xff] %vm452_vm2, %v1309_v43 }
  0xaa   : > { %v362_v44 = vpop.f32.mrf.mxu0  ;;  %v1314_v45 = vpop.f32.mrf.mxu3 }
  0xab   : > { %455 = vst.msk [vmem:[%s1283_s27 + $0x10] sm:$0xff] %vm452_vm2, %v362_v44  ;;  %v557_v62 = vmul.f32 %v362_v44, %v362_v44  ;;  %v488_v1 = vsel %vm452_vm2, %v362_v44, 0.0  ;;  %v500_v44 = vsel %vm452_vm2, %v1287_v38, 0.0 }
  0xac   : > { %v1318_v46 = vpop.f32.mrf.mxu1  ;;  %477 = vst.msk [vmem:[%s1283_s27 + $0xc0] sm:$0xff] %vm452_vm2, %v1314_v45  ;;  %v489_v10 = vadd.f32 %v488_v1, %v487_v3 }
  0xad   : > { %463 = vst.msk [vmem:[%s1283_s27 + $0x50] sm:$0xff] %vm452_vm2, %v1318_v46  ;;  %v590_v6 = vsel %vm452_vm2, %v557_v62, 0.0  ;;  %v565_v62 = vmul.f32 %v1318_v46, %v1318_v46 }
  0xae   : > { %v591_v16 = vadd.f32 %v590_v6, %v589_v9  ;;  %v661_v6 = vld [vmem:[%s1771_s3 + $0x10] sm:$0xff] }
  0xaf   : > { %679 = vmatpush.msrb.mxu1 %v661_v6 }
  0xb0   : > { %v1326_v47 = vpop.f32.mrf.mxu2 }
  0xb1   : > { %469 = vst.msk [vmem:[%s1283_s27 + $0x80] sm:$0xff] %vm452_vm2, %v1326_v47 }
  0xb2   : > { %v365_v48 = vpop.f32.mrf.mxu0  ;;  %v1331_v49 = vpop.f32.mrf.mxu3 }
  0xb3   : > { %456 = vst.msk [vmem:[%s1283_s27 + $0x18] sm:$0xff] %vm452_vm2, %v365_v48  ;;  %v558_v2 = vmul.f32 %v365_v48, %v365_v48  ;;  %v490_v7 = vsel %vm452_vm2, %v365_v48, 0.0  ;;  %v564_v48 = vmul.f32 %v1301_v42, %v1301_v42 }
  0xb4   : > { %v1335_v50 = vpop.f32.mrf.mxu1  ;;  %478 = vst.msk [vmem:[%s1283_s27 + $0xc8] sm:$0xff] %vm452_vm2, %v1331_v49  ;;  %v491_v17 = vadd.f32 %v490_v7, %v489_v10 }
  0xb5   : > { %464 = vst.msk [vmem:[%s1283_s27 + $0x58] sm:$0xff] %vm452_vm2, %v1335_v50  ;;  %v592_v13 = vsel %vm452_vm2, %v558_v2, 0.0  ;;  %v604_v38 = vsel %vm452_vm2, %v564_v48, 0.0  ;;  %v504_v2 = vsel %vm452_vm2, %v1318_v46, 0.0  ;;  %v566_v3 = vmul.f32 %v1335_v50, %v1335_v50 }
  0xb6   : > { %v593_v21 = vadd.f32 %v592_v13, %v591_v16  ;;  %v506_v9 = vsel %vm452_vm2, %v1335_v50, 0.0 }
  0xb8   : > { %v1343_v51 = vpop.f32.mrf.mxu2 }
  0xb9   : > { %470 = vst.msk [vmem:[%s1283_s27 + $0x88] sm:$0xff] %vm452_vm2, %v1343_v51 }
  0xba   : > { %v368_v52 = vpop.f32.mrf.mxu0  ;;  %v1348_v53 = vpop.f32.mrf.mxu3 }
  0xbb   : > { %457 = vst.msk [vmem:[%s1283_s27 + $0x20] sm:$0xff] %vm452_vm2, %v368_v52  ;;  %v559_v8 = vmul.f32 %v368_v52, %v368_v52  ;;  %v492_v14 = vsel %vm452_vm2, %v368_v52, 0.0 }
  0xbc   : > { %v1352_v54 = vpop.f32.mrf.mxu1  ;;  %479 = vst.msk [vmem:[%s1283_s27 + $0xd0] sm:$0xff] %vm452_vm2, %v1348_v53  ;;  %v493_v22 = vadd.f32 %v492_v14, %v491_v17  ;;  %v608_v14 = vsel %vm452_vm2, %v566_v3, 0.0 }
  0xbd   : > { %465 = vst.msk [vmem:[%s1283_s27 + $0x60] sm:$0xff] %vm452_vm2, %v1352_v54  ;;  %v594_v18 = vsel %vm452_vm2, %v559_v8, 0.0  ;;  %v606_v8 = vsel %vm452_vm2, %v565_v62, 0.0  ;;  %v567_v46 = vmul.f32 %v1352_v54, %v1352_v54 }
  0xbe   : > { %v595_v25 = vadd.f32 %v594_v18, %v593_v21  ;;  %v569_v18 = vmul.f32 %v1292_v39, %v1292_v39 }
  0xc0   : > { %v1360_v55 = vpop.f32.mrf.mxu2  ;;  %v614_v28 = vsel %vm452_vm2, %v569_v18, 0.0 }
  0xc1   : > { %471 = vst.msk [vmem:[%s1283_s27 + $0x90] sm:$0xff] %vm452_vm2, %v1360_v55  ;;  %v573_v48 = vmul.f32 %v1360_v55, %v1360_v55 }
  0xc2   : > { %v371_v56 = vpop.f32.mrf.mxu0  ;;  %v1365_v57 = vpop.f32.mrf.mxu3 }
  0xc3   : > { %458 = vst.msk [vmem:[%s1283_s27 + $0x28] sm:$0xff] %vm452_vm2, %v371_v56  ;;  %v560_v15 = vmul.f32 %v371_v56, %v371_v56  ;;  %v494_v19 = vsel %vm452_vm2, %v371_v56, 0.0 }
  0xc4   : > { %v1369_v59 = vpop.f32.mrf.mxu1  ;;  %480 = vst.msk [vmem:[%s1283_s27 + $0xd8] sm:$0xff] %vm452_vm2, %v1365_v57  ;;  %v495_v26 = vadd.f32 %v494_v19, %v493_v22  ;;  %v610_v19 = vsel %vm452_vm2, %v567_v46, 0.0 }
  0xc5   : > { %466 = vst.msk [vmem:[%s1283_s27 + $0x68] sm:$0xff] %vm452_vm2, %v1369_v59  ;;  %v596_v23 = vsel %vm452_vm2, %v560_v15, 0.0  ;;  %v568_v10 = vmul.f32 %v1369_v59, %v1369_v59  ;;  %v508_v15 = vsel %vm452_vm2, %v1352_v54, 0.0  ;;  %v510_v50 = vsel %vm452_vm2, %v1369_v59, 0.0 }
  0xc6   : > { %v597_v30 = vadd.f32 %v596_v23, %v595_v25  ;;  %v570_v54 = vmul.f32 %v1309_v43, %v1309_v43 }
  0xc8   : > { %v1381_v4 = vpop.f32.mrf.mxu2  ;;  %v616_v34 = vsel %vm452_vm2, %v570_v54, 0.0 }
  0xc9   : > { %472 = vst.msk [vmem:[%s1283_s27 + $0x98] sm:$0xff] %vm452_vm2, %v1381_v4 }
  0xca   : > { %v374_v11 = vpop.f32.mrf.mxu0  ;;  %v1389_v12 = vpop.f32.mrf.mxu3 }
  0xcb   : > { %459 = vst.msk [vmem:[%s1283_s27 + $0x30] sm:$0xff] %vm452_vm2, %v374_v11  ;;  %v561_v20 = vmul.f32 %v374_v11, %v374_v11  ;;  %v496_v24 = vsel %vm452_vm2, %v374_v11, 0.0 }
  0xcc   : > { %481 = vst.msk [vmem:[%s1283_s27 + $0xe0] sm:$0xff] %vm452_vm2, %v1389_v12  ;;  %v497_v31 = vadd.f32 %v496_v24, %v495_v26  ;;  %v512_v24 = vsel %vm452_vm2, %v1292_v39, 0.0 }
  0xcd   : > { %v598_v29 = vsel %vm452_vm2, %v561_v20, 0.0  ;;  %v612_v20 = vsel %vm452_vm2, %v568_v10, 0.0 }
  0xce   : > { %v599_v37 = vadd.f32 %v598_v29, %v597_v30  ;;  %v514_v29 = vsel %vm452_vm2, %v1309_v43, 0.0  ;;  %v571_v30 = vmul.f32 %v1326_v47, %v1326_v47  ;;  %v572_v43 = vmul.f32 %v1343_v51, %v1343_v51 }
  0xd0   : > { %v1402_v27 = vpop.f32.mrf.mxu2 }
  0xd1   : > { %473 = vst.msk [vmem:[%s1283_s27 + $0xa0] sm:$0xff] %vm452_vm2, %v1402_v27 }
  0xd2   : > { %v377_v32 = vpop.f32.mrf.mxu0  ;;  %v1411_v33 = vpop.f32.mrf.mxu3 }
  0xd3   : > { %460 = vst.msk [vmem:[%s1283_s27 + $0x38] sm:$0xff] %vm452_vm2, %v377_v32  ;;  %v498_v35 = vsel %vm452_vm2, %v377_v32, 0.0  ;;  %v562_v36 = vmul.f32 %v377_v32, %v377_v32  ;;  %v660_v32 = vld [vmem:[%s1771_s3 + $0x8] sm:$0xff] }
  0xd4   : > { %v499_v40 = vadd.f32 %v498_v35, %v497_v31  ;;  %482 = vst.msk [vmem:[%s1283_s27 + $0xe8] sm:$0xff] %vm452_vm2, %v1411_v33  ;;  %v516_v35 = vsel %vm452_vm2, %v1326_v47, 0.0  ;;  %680 = vmatpush.msrb.mxu1 %v660_v32  ;;  %v520_v47 = vsel %vm452_vm2, %v1360_v55, 0.0  ;;  %v524_v55 = vsel %vm452_vm2, %v1402_v27, 0.0 }
  0xd5   : > { %v600_v52 = vsel %vm452_vm2, %v562_v36, 0.0 }
  0xd6   : > { %v501_v56 = vadd.f32 %v500_v44, %v499_v40  ;;  %v601_v58 = vadd.f32 %v600_v52, %v599_v37  ;;  %v618_v40 = vsel %vm452_vm2, %v571_v30, 0.0  ;;  %v518_v44 = vsel %vm452_vm2, %v1343_v51, 0.0 }
  0xd7   : > { %v522_v51 = vsel %vm452_vm2, %v1381_v4, 0.0  ;;  %v582_v30 = vmul.f32 %v1365_v57, %v1365_v57 }
  0xd8   : > { %v503_v63 = vadd.f32 %v502_v61, %v501_v56  ;;  %v603_v0 = vadd.f32 %v602_v60, %v601_v58  ;;  %v1431_v1 = vpop.f32.mrf.mxu2  ;;  %v620_v58 = vsel %vm452_vm2, %v572_v43, 0.0  ;;  %v574_v60 = vmul.f32 %v1381_v4, %v1381_v4  ;;  %v659_v4 = vld [vmem:[%s1771_s3] sm:$0xff] }
  0xd9   : > { %474 = vst.msk [vmem:[%s1283_s27 + $0xa8] sm:$0xff] %vm452_vm2, %v1431_v1  ;;  %v526_v46 = vsel %vm452_vm2, %v1431_v1, 0.0  ;;  %681 = vmatpush.msrb.mxu1 %v659_v4 }
  0xda   : > { %v605_v42 = vadd.f32 %v604_v38, %v603_v0  ;;  %v505_v5 = vadd.f32 %v504_v2, %v503_v63  ;;  %v1444_v7 = vpop.f32.mrf.mxu3  ;;  %v622_v63 = vsel %vm452_vm2, %v573_v48, 0.0  ;;  %v575_v0 = vmul.f32 %v1402_v27, %v1402_v27 }
  0xdb   : > { %483 = vst.msk [vmem:[%s1283_s27 + $0xf0] sm:$0xff] %vm452_vm2, %v1444_v7  ;;  %v624_v3 = vsel %vm452_vm2, %v574_v60, 0.0  ;;  %v544_v60 = vsel %vm452_vm2, %v1444_v7, 0.0 }
  0xdc   : > { %v507_v11 = vadd.f32 %v506_v9, %v505_v5  ;;  %v607_v13 = vadd.f32 %v606_v8, %v605_v42  ;;  %v576_v42 = vmul.f32 %v1431_v1, %v1431_v1  ;;  %v626_v9 = vsel %vm452_vm2, %v575_v0, 0.0 }
  0xdd   : > { %v579_v1 = vmul.f32 %v1314_v45, %v1314_v45 }
  0xde   : > { %v509_v16 = vadd.f32 %v508_v15, %v507_v11  ;;  %v609_v17 = vadd.f32 %v608_v14, %v607_v13  ;;  %v578_v13 = vmul.f32 %v1297_v41, %v1297_v41  ;;  %v628_v14 = vsel %vm452_vm2, %v576_v42, 0.0 }
  0xdf   : > { %v634_v54 = vsel %vm452_vm2, %v579_v1, 0.0 }
  0xe0   : > { %v611_v21 = vadd.f32 %v610_v19, %v609_v17  ;;  %v511_v22 = vadd.f32 %v510_v50, %v509_v16  ;;  %v422_v23 = vpop.f32.mrf.mxu2  ;;  %v530_v17 = vsel %vm452_vm2, %v1297_v41, 0.0  ;;  %v534_v41 = vsel %vm452_vm2, %v1331_v49, 0.0 }
  0xe1   : > { %475 = vst.msk [vmem:[%s1283_s27 + $0xb0] sm:$0xff] %vm452_vm2, %v422_v23  ;;  %v577_v5 = vmul.f32 %v422_v23, %v422_v23  ;;  %v528_v10 = vsel %vm452_vm2, %v422_v23, 0.0 }
  0xe2   : > { %v513_v59 = vadd.f32 %v512_v24, %v511_v22  ;;  %v613_v25 = vadd.f32 %v612_v20, %v611_v21  ;;  %v1471_v26 = vpop.f32.mrf.mxu3  ;;  %v632_v20 = vsel %vm452_vm2, %v578_v13, 0.0  ;;  %v532_v21 = vsel %vm452_vm2, %v1314_v45, 0.0 }
  0xe3   : > { %484 = vst.msk [vmem:[%s1283_s27 + $0xf8] sm:$0xff] %vm452_vm2, %v1471_v26  ;;  %v630_v15 = vsel %vm452_vm2, %v577_v5, 0.0  ;;  %v580_v22 = vmul.f32 %v1331_v49, %v1331_v49  ;;  %v536_v45 = vsel %vm452_vm2, %v1348_v53, 0.0  ;;  %v538_v49 = vsel %vm452_vm2, %v1365_v57, 0.0 }
  0xe4   : > { %v515_v39 = vadd.f32 %v514_v29, %v513_v59  ;;  %v615_v31 = vadd.f32 %v614_v28, %v613_v25  ;;  %v581_v59 = vmul.f32 %v1348_v53, %v1348_v53  ;;  %v540_v53 = vsel %vm452_vm2, %v1389_v12, 0.0 }
  0xe5   : > { %v636_v29 = vsel %vm452_vm2, %v580_v22, 0.0  ;;  %v542_v57 = vsel %vm452_vm2, %v1411_v33, 0.0 }
  0xe6   : > { %v517_v36 = vadd.f32 %v516_v35, %v515_v39  ;;  %v617_v37 = vadd.f32 %v616_v34, %v615_v31  ;;  %v638_v32 = vsel %vm452_vm2, %v581_v59, 0.0  ;;  %v583_v34 = vmul.f32 %v1389_v12, %v1389_v12  ;;  %v205_v59 = vld [vmem:[%s1770_s2 + $0x1] sm:$0x1] }
  0xe8   : > { %v619_v52 = vadd.f32 %v618_v40, %v617_v37  ;;  %v519_v56 = vadd.f32 %v518_v44, %v517_v36  ;;  %v640_v36 = vsel %vm452_vm2, %v582_v30, 0.0  ;;  %v584_v37 = vmul.f32 %v1411_v33, %v1411_v33  ;;  %v712_v30 = vld [vmem:[%s1283_s27 + $0x8] sm:$0xff] }
  0xe9   : > { %v642_v48 = vsel %vm452_vm2, %v583_v34, 0.0 }
  0xea   : > { %v521_v61 = vadd.f32 %v520_v47, %v519_v56  ;;  %v621_v62 = vadd.f32 %v620_v58, %v619_v52  ;;  %v585_v52 = vmul.f32 %v1444_v7, %v1444_v7  ;;  %v586_v56 = vmul.f32 %v1471_v26, %v1471_v26 }
  0xeb   : > { %v644_v12 = vsel %vm452_vm2, %v584_v37, 0.0 }
  0xec   : > { %v523_v38 = vadd.f32 %v522_v51, %v521_v61  ;;  %v623_v2 = vadd.f32 %v622_v63, %v621_v62  ;;  %v546_v61 = vsel %vm452_vm2, %v1471_v26, 0.0  ;;  %v646_v33 = vsel %vm452_vm2, %v585_v52, 0.0 }
  0xed   : > { %v648_v51 = vsel %vm452_vm2, %v586_v56, 0.0  ;;  %v718_v56 = vld [vmem:[%s1283_s27 + $0x38] sm:$0xff] }
  0xee   : > { %v525_v6 = vadd.f32 %v524_v55, %v523_v38  ;;  %v625_v8 = vadd.f32 %v624_v3, %v623_v2 }
  0xf0   : > { %v627_v11 = vadd.f32 %v626_v9, %v625_v8  ;;  %v527_v27 = vadd.f32 %v526_v46, %v525_v6 }
  0xf2   : > { %v629_v50 = vadd.f32 %v628_v14, %v627_v11  ;;  %v529_v16 = vadd.f32 %v528_v10, %v527_v27 }
  0xf4   : > { %v531_v18 = vadd.f32 %v530_v17, %v529_v16  ;;  %v631_v19 = vadd.f32 %v630_v15, %v629_v50 }
  0xf6   : > { %v533_v23 = vadd.f32 %v532_v21, %v531_v18  ;;  %v633_v24 = vadd.f32 %v632_v20, %v631_v19  ;;  %v204_v18 = vld [vmem:[%s1770_s2] sm:$0x1] }
  0xf7   : > { %v703_v21 = vrot.slane %v204_v18, 7 }
  0xf8   : > { %v535_v25 = vadd.f32 %v534_v41, %v533_v23  ;;  %v635_v28 = vadd.f32 %v634_v54, %v633_v24 }
  0xfa   : > { %v637_v39 = vadd.f32 %v636_v29, %v635_v28  ;;  %v537_v31 = vadd.f32 %v536_v45, %v535_v25  ;;  %v711_v45 = vld [vmem:[%s1283_s27] sm:$0xff] }
  0xfc   : > { %v539_v35 = vadd.f32 %v538_v49, %v537_v31  ;;  %v639_v43 = vadd.f32 %v638_v32, %v637_v39  ;;  %v713_v39 = vld [vmem:[%s1283_s27 + $0x10] sm:$0xff]  ;;  %v714_v31 = vld [vmem:[%s1283_s27 + $0x18] sm:$0xff]  ;;  %v715_v49 = vld [vmem:[%s1283_s27 + $0x20] sm:$0xff] }
  0xfe   : > { %v541_v40 = vadd.f32 %v540_v53, %v539_v35  ;;  %v641_v44 = vadd.f32 %v640_v36, %v639_v43  ;;  %v716_v36 = vld [vmem:[%s1283_s27 + $0x28] sm:$0xff] }
 0x100   : > { %v543_v58 = vadd.f32 %v542_v57, %v541_v40  ;;  %v643_v47 = vadd.f32 %v642_v48, %v641_v44  ;;  %v717_v40 = vld [vmem:[%s1283_s27 + $0x30] sm:$0xff] }
 0x102   : > { %v645_v62 = vadd.f32 %v644_v12, %v643_v47  ;;  %v545_v63 = vadd.f32 %v544_v60, %v543_v58  ;;  %v719_v12 = vld [vmem:[%s1283_s27 + $0x40] sm:$0xff]  ;;  %v720_v60 = vld [vmem:[%s1283_s27 + $0x48] sm:$0xff] }
 0x104   : > { %v647_v0 = vadd.f32 %v646_v33, %v645_v62  ;;  %v547_v38 = vadd.f32 %v546_v61, %v545_v63 }
 0x106   : > { %v548_v2 = vrot.slane %v547_v38, 4  ;;  %v649_v3 = vadd.f32 %v648_v51, %v647_v0 }
 0x108   : > { %v549_v55 = vadd.f32 %v548_v2, %v547_v38  ;;  %v650_v42 = vrot.slane %v649_v3, 4  ;;  %v721_v38 = vld [vmem:[%s1283_s27 + $0x50] sm:$0xff] }
 0x10a   : > { %v550_v5 = vrot.slane %v549_v55, 2  ;;  %v651_v6 = vadd.f32 %v650_v42, %v649_v3 }
 0x10c   : > { %v551_v8 = vadd.f32 %v550_v5, %v549_v55  ;;  %v652_v4 = vrot.slane %v651_v6, 2  ;;  %v722_v5 = vld [vmem:[%s1283_s27 + $0x58] sm:$0xff] }
 0x10e   : > { %v552_v7 = vrot.slane %v551_v8, 1  ;;  %v653_v9 = vadd.f32 %v652_v4, %v651_v6 }
 0x110   : > { %v654_v46 = vrot.slane %v653_v9, 1  ;;  %v553_v26 = vadd.f32 %v552_v7, %v551_v8  ;;  %v723_v7 = vld [vmem:[%s1283_s27 + $0x60] sm:$0xff] }
 0x112   : > { %v655_v10 = vadd.f32 %v654_v46, %v653_v9 }
 0x114   : > { %v658_v11 = vsel %vm657_vm3, %v553_v26, %v655_v10  ;;  %v724_v10 = vld [vmem:[%s1283_s27 + $0x68] sm:$0xff] }
 0x115   : > { %991 = vmatmul.msk.f32.vlgmr.msrb.gmra.mxu1 %vm452_vm2, %v658_v11 }
 0x192   : > { %v683_v27 = vpop.f32.mrf.mxu1 }
 0x193   : > { %v686_v13 = vmul.f32 %v683_v27, %v683_v27 }
 0x195   : > { %v688_v14 = vrot.slane %v686_v13, 7 }
 0x197   : > { %v690_v15 = vsub.f32 %v683_v27, %v688_v14  ;;  %v725_v14 = vld [vmem:[%s1283_s27 + $0x70] sm:$0xff] }
 0x199   : > { %v691_v50 = vadd.f32 1e-05, %v690_v15 }
 0x19b   : > { %1054 = vrsqrt.f32 %v691_v50  ;;  %vm698_vm5 = vweird.f32 %v691_v50 }
 0x1a1   : > { %v1055_v16 = vpop.eup %1054 }
 0x1a2   : > { %v693_v17 = vmul.f32 %v1055_v16, %v691_v50  ;;  %vm699_vm4 = vweird.f32 %v1055_v16 }
 0x1a3   : > { %vm700_vm6 = vmor %vm698_vm5, %vm699_vm4 }
 0x1a4   : > { %v694_v1 = vmul.f32 %v1055_v16, %v693_v17  ;;  %v726_v17 = vld [vmem:[%s1283_s27 + $0x78] sm:$0xff] }
 0x1a6   : > { %v695_v19 = vmul.f32 0.5, %v694_v1 }
 0x1a8   : > { %v696_v20 = vsub.f32 1.5, %v695_v19 }
 0x1aa   : > { %v697_v22 = vmul.f32 %v1055_v16, %v696_v20  ;;  %v727_v20 = vld [vmem:[%s1283_s27 + $0x80] sm:$0xff] }
 0x1ac   : > { %v701_v23 = vsel %vm700_vm6, %v1055_v16, %v697_v22 }
 0x1ad   : > { %v705_v24 = vmul.f32 %v703_v21, %v701_v23 }
 0x1af   : > { %v707_v54 = vrot.slane %v705_v24, 1  ;;  %v1570_v28 = vperm.slane %v705_v24, 1  ;;  %v728_v24 = vld [vmem:[%s1283_s27 + $0x88] sm:$0xff] }
 0x1b1   : > { %v709_v41 = vmul.f32 %v707_v54, %v683_v27  ;;  %v744_v32 = vmul.f32 %v1570_v28, %v711_v45  ;;  %v745_v34 = vmul.f32 %v1570_v28, %v712_v30  ;;  %v746_v35 = vmul.f32 %v1570_v28, %v713_v39 }
 0x1b2   : > { %v747_v43 = vmul.f32 %v1570_v28, %v714_v31  ;;  %v748_v53 = vmul.f32 %v1570_v28, %v715_v49  ;;  %v749_v44 = vmul.f32 %v1570_v28, %v716_v36  ;;  %v750_v58 = vmul.f32 %v1570_v28, %v717_v40  ;;  %v730_v31 = vld [vmem:[%s1283_s27 + $0x98] sm:$0xff] }
 0x1b3   : > { %v710_v25 = vsub.f32 %v205_v59, %v709_v41  ;;  %v751_v61 = vmul.f32 %v1570_v28, %v718_v56  ;;  %v752_v63 = vmul.f32 %v1570_v28, %v719_v12  ;;  %v753_v33 = vmul.f32 %v1570_v28, %v720_v60 }
 0x1b4   : > { %v754_v6 = vmul.f32 %v1570_v28, %v721_v38  ;;  %v755_v9 = vmul.f32 %v1570_v28, %v722_v5  ;;  %v756_v11 = vmul.f32 %v1570_v28, %v723_v7  ;;  %v757_v15 = vmul.f32 %v1570_v28, %v724_v10 }
 0x1b5   : > { %v1572_v29 = vperm.slane %v710_v25, 0  ;;  %v758_v1 = vmul.f32 %v1570_v28, %v725_v14  ;;  %v759_v21 = vmul.f32 %v1570_v28, %v726_v17  ;;  %v760_v54 = vmul.f32 %v1570_v28, %v727_v20  ;;  %v729_v25 = vld [vmem:[%s1283_s27 + $0x90] sm:$0xff] }
 0x1b6   : > { %v761_v45 = vmul.f32 %v1570_v28, %v728_v24 }
 0x1b7   : > { %v777_v37 = vadd.f32 %v1572_v29, %v744_v32  ;;  %v778_v48 = vadd.f32 %v1572_v29, %v745_v34  ;;  %v779_v57 = vadd.f32 %v1572_v29, %v746_v35  ;;  %v780_v52 = vadd.f32 %v1572_v29, %v747_v43  ;;  %v731_v35 = vld [vmem:[%s1283_s27 + $0xa0] sm:$0xff] }
 0x1b8   : > { %v781_v47 = vadd.f32 %v1572_v29, %v748_v53  ;;  %v782_v62 = vadd.f32 %v1572_v29, %v749_v44  ;;  %v783_v51 = vadd.f32 %v1572_v29, %v750_v58  ;;  %v784_v2 = vadd.f32 %v1572_v29, %v751_v61 }
 0x1b9   : > { %v809_v0 = vmax.f32 %v777_v37, 0.0  ;;  %v810_v3 = vmax.f32 %v778_v48, 0.0  ;;  %v811_v55 = vmax.f32 %v779_v57, 0.0  ;;  %v812_v42 = vmax.f32 %v780_v52, 0.0  ;;  %v732_v37 = vld [vmem:[%s1283_s27 + $0xa8] sm:$0xff]  ;;  %v733_v57 = vld [vmem:[%s1283_s27 + $0xb0] sm:$0xff] }
 0x1ba   : > { %v785_v8 = vadd.f32 %v1572_v29, %v752_v63  ;;  %v813_v4 = vmax.f32 %v781_v47, 0.0  ;;  %v786_v46 = vadd.f32 %v1572_v29, %v753_v33  ;;  %v814_v26 = vmax.f32 %v782_v62, 0.0  ;;  %v734_v47 = vld [vmem:[%s1283_s27 + $0xb8] sm:$0xff]  ;;  %v735_v62 = vld [vmem:[%s1283_s27 + $0xc0] sm:$0xff] }
 0x1bb   : > { %841 = vst.msk [vmem:[%s1283_s27] sm:$0xff] %vm452_vm2, %v809_v0  ;;  %v787_v27 = vadd.f32 %v1572_v29, %v754_v6  ;;  %v815_v13 = vmax.f32 %v783_v51, 0.0  ;;  %v788_v50 = vadd.f32 %v1572_v29, %v755_v9  ;;  %v816_v16 = vmax.f32 %v784_v2, 0.0  ;;  %v736_v0 = vld [vmem:[%s1283_s27 + $0xc8] sm:$0xff] }
 0x1bc   : > { %842 = vst.msk [vmem:[%s1283_s27 + $0x8] sm:$0xff] %vm452_vm2, %v810_v3  ;;  %v789_v18 = vadd.f32 %v1572_v29, %v756_v11  ;;  %v817_v19 = vmax.f32 %v785_v8, 0.0  ;;  %v790_v22 = vadd.f32 %v1572_v29, %v757_v15  ;;  %v818_v23 = vmax.f32 %v786_v46, 0.0  ;;  %v738_v8 = vld [vmem:[%s1283_s27 + $0xd8] sm:$0xff]  ;;  %v739_v46 = vld [vmem:[%s1283_s27 + $0xe0] sm:$0xff] }
 0x1bd   : > { %843 = vst.msk [vmem:[%s1283_s27 + $0x10] sm:$0xff] %vm452_vm2, %v811_v55  ;;  %v791_v41 = vadd.f32 %v1572_v29, %v758_v1  ;;  %v819_v59 = vmax.f32 %v787_v27, 0.0  ;;  %v792_v30 = vadd.f32 %v1572_v29, %v759_v21  ;;  %v820_v39 = vmax.f32 %v788_v50, 0.0  ;;  %v737_v55 = vld [vmem:[%s1283_s27 + $0xd0] sm:$0xff]  ;;  %v740_v27 = vld [vmem:[%s1283_s27 + $0xe8] sm:$0xff] }
 0x1be   : > { %844 = vst.msk [vmem:[%s1283_s27 + $0x18] sm:$0xff] %vm452_vm2, %v812_v42  ;;  %v762_v32 = vmul.f32 %v1570_v28, %v729_v25  ;;  %v793_v49 = vadd.f32 %v1572_v29, %v760_v54  ;;  %v821_v34 = vmax.f32 %v789_v18, 0.0  ;;  %v763_v43 = vmul.f32 %v1570_v28, %v730_v31  ;;  %v741_v50 = vld [vmem:[%s1283_s27 + $0xf0] sm:$0xff]  ;;  %v742_v18 = vld [vmem:[%s1283_s27 + $0xf8] sm:$0xff] }
 0x1bf   : > { %845 = vst.msk [vmem:[%s1283_s27 + $0x20] sm:$0xff] %vm452_vm2, %v813_v4  ;;  %v794_v36 = vadd.f32 %v1572_v29, %v761_v45  ;;  %v822_v53 = vmax.f32 %v790_v22, 0.0  ;;  %v764_v40 = vmul.f32 %v1570_v28, %v731_v35  ;;  %v823_v48 = vmax.f32 %v791_v41, 0.0 }
 0x1c0   : > { %846 = vst.msk [vmem:[%s1283_s27 + $0x28] sm:$0xff] %vm452_vm2, %v814_v26  ;;  %v795_v44 = vadd.f32 %v1572_v29, %v762_v32  ;;  %v765_v52 = vmul.f32 %v1570_v28, %v732_v37  ;;  %v796_v56 = vadd.f32 %v1572_v29, %v763_v43  ;;  %v824_v58 = vmax.f32 %v792_v30, 0.0 }
 0x1c1   : > { %847 = vst.msk [vmem:[%s1283_s27 + $0x30] sm:$0xff] %vm452_vm2, %v815_v13  ;;  %v766_v12 = vmul.f32 %v1570_v28, %v733_v57  ;;  %v797_v60 = vadd.f32 %v1572_v29, %v764_v40  ;;  %v825_v61 = vmax.f32 %v793_v49, 0.0  ;;  %v767_v63 = vmul.f32 %v1570_v28, %v734_v47 }
 0x1c2   : > { %848 = vst.msk [vmem:[%s1283_s27 + $0x38] sm:$0xff] %vm452_vm2, %v816_v16  ;;  %v798_v33 = vadd.f32 %v1572_v29, %v765_v52  ;;  %v826_v51 = vmax.f32 %v794_v36, 0.0  ;;  %v768_v38 = vmul.f32 %v1570_v28, %v735_v62  ;;  %v827_v3 = vmax.f32 %v795_v44, 0.0 }
 0x1c3   : > { %849 = vst.msk [vmem:[%s1283_s27 + $0x40] sm:$0xff] %vm452_vm2, %v817_v19  ;;  %v799_v2 = vadd.f32 %v1572_v29, %v766_v12  ;;  %v769_v42 = vmul.f32 %v1570_v28, %v736_v0  ;;  %v800_v5 = vadd.f32 %v1572_v29, %v767_v63  ;;  %v828_v6 = vmax.f32 %v796_v56, 0.0 }
 0x1c4   : > { %850 = vst.msk [vmem:[%s1283_s27 + $0x48] sm:$0xff] %vm452_vm2, %v818_v23  ;;  %v770_v4 = vmul.f32 %v1570_v28, %v737_v55  ;;  %v801_v7 = vadd.f32 %v1572_v29, %v768_v38  ;;  %v829_v9 = vmax.f32 %v797_v60, 0.0  ;;  %v771_v26 = vmul.f32 %v1570_v28, %v738_v8 }
 0x1c5   : > { %851 = vst.msk [vmem:[%s1283_s27 + $0x50] sm:$0xff] %vm452_vm2, %v819_v59  ;;  %v802_v10 = vadd.f32 %v1572_v29, %v769_v42  ;;  %v830_v11 = vmax.f32 %v798_v33, 0.0  ;;  %v772_v13 = vmul.f32 %v1570_v28, %v739_v46  ;;  %v831_v15 = vmax.f32 %v799_v2, 0.0 }
 0x1c6   : > { %852 = vst.msk [vmem:[%s1283_s27 + $0x58] sm:$0xff] %vm452_vm2, %v820_v39  ;;  %v803_v14 = vadd.f32 %v1572_v29, %v770_v4  ;;  %v773_v16 = vmul.f32 %v1570_v28, %v740_v27  ;;  %v804_v17 = vadd.f32 %v1572_v29, %v771_v26  ;;  %v832_v1 = vmax.f32 %v800_v5, 0.0 }
 0x1c7   : > { %853 = vst.msk [vmem:[%s1283_s27 + $0x60] sm:$0xff] %vm452_vm2, %v821_v34  ;;  %v774_v19 = vmul.f32 %v1570_v28, %v741_v50  ;;  %v805_v20 = vadd.f32 %v1572_v29, %v772_v13  ;;  %v833_v21 = vmax.f32 %v801_v7, 0.0  ;;  %v775_v22 = vmul.f32 %v1570_v28, %v742_v18 }
 0x1c8   : > { %854 = vst.msk [vmem:[%s1283_s27 + $0x68] sm:$0xff] %vm452_vm2, %v822_v53  ;;  %v806_v23 = vadd.f32 %v1572_v29, %v773_v16  ;;  %v834_v24 = vmax.f32 %v802_v10, 0.0  ;;  %v835_v41 = vmax.f32 %v803_v14, 0.0  ;;  %v836_v28 = vmax.f32 %v804_v17, 0.0 }
 0x1c9   : > { %855 = vst.msk [vmem:[%s1283_s27 + $0x70] sm:$0xff] %vm452_vm2, %v823_v48  ;;  %v807_v54 = vadd.f32 %v1572_v29, %v774_v19  ;;  %v808_v59 = vadd.f32 %v1572_v29, %v775_v22  ;;  %v837_v25 = vmax.f32 %v805_v20, 0.0 }
 0x1ca   : > { %856 = vst.msk [vmem:[%s1283_s27 + $0x78] sm:$0xff] %vm452_vm2, %v824_v58  ;;  %v838_v45 = vmax.f32 %v806_v23, 0.0 }
 0x1cb   : > { %857 = vst.msk [vmem:[%s1283_s27 + $0x80] sm:$0xff] %vm452_vm2, %v825_v61  ;;  %v839_v30 = vmax.f32 %v807_v54, 0.0  ;;  %v840_v29 = vmax.f32 %v808_v59, 0.0 }
 0x1cc   : > { %858 = vst.msk [vmem:[%s1283_s27 + $0x88] sm:$0xff] %vm452_vm2, %v826_v51 }
 0x1cd   : > { %859 = vst.msk [vmem:[%s1283_s27 + $0x90] sm:$0xff] %vm452_vm2, %v827_v3 }
 0x1ce   : > { %860 = vst.msk [vmem:[%s1283_s27 + $0x98] sm:$0xff] %vm452_vm2, %v828_v6 }
 0x1cf   : > { %861 = vst.msk [vmem:[%s1283_s27 + $0xa0] sm:$0xff] %vm452_vm2, %v829_v9 }
 0x1d0   : > { %862 = vst.msk [vmem:[%s1283_s27 + $0xa8] sm:$0xff] %vm452_vm2, %v830_v11 }
 0x1d1   : > { %863 = vst.msk [vmem:[%s1283_s27 + $0xb0] sm:$0xff] %vm452_vm2, %v831_v15 }
 0x1d2   : > { %864 = vst.msk [vmem:[%s1283_s27 + $0xb8] sm:$0xff] %vm452_vm2, %v832_v1 }
 0x1d3   : > { %865 = vst.msk [vmem:[%s1283_s27 + $0xc0] sm:$0xff] %vm452_vm2, %v833_v21 }
 0x1d4   : > { %866 = vst.msk [vmem:[%s1283_s27 + $0xc8] sm:$0xff] %vm452_vm2, %v834_v24 }
 0x1d5   : > { %867 = vst.msk [vmem:[%s1283_s27 + $0xd0] sm:$0xff] %vm452_vm2, %v835_v41 }
 0x1d6   : > { %868 = vst.msk [vmem:[%s1283_s27 + $0xd8] sm:$0xff] %vm452_vm2, %v836_v28 }
 0x1d7   : > { %869 = vst.msk [vmem:[%s1283_s27 + $0xe0] sm:$0xff] %vm452_vm2, %v837_v25 }
 0x1d8   : > { %870 = vst.msk [vmem:[%s1283_s27 + $0xe8] sm:$0xff] %vm452_vm2, %v838_v45 }
 0x1d9   : > { %871 = vst.msk [vmem:[%s1283_s27 + $0xf0] sm:$0xff] %vm452_vm2, %v839_v30 }
 0x1da   : > { %872 = vst.msk [vmem:[%s1283_s27 + $0xf8] sm:$0xff] %vm452_vm2, %v840_v29 }
 0x1db   : > { %1083 = shalt.err (!%p1080_p3)
}
 0x1dc   : > { %s1120_s22 = smov 128   ;;  %s1121_s27 = smov 8  }
 0x1dd   : > { %1013 = dma.vmem_to_hbm [thread:$0]  (%p1185_p5), %s887_s28, 4096, %s889_s29, %s874_s30, %s1120_s22, %s1120_s22, %s1121_s27  }
 0x1de PF: > { %p1019_p4 = scmp.ge.s32.totalorder %s1118_s18, 2  ;;  %s903_s12 = sand.u32 1, %s1106_s15  }
 0x1df   : > { %s904_s13 = scalar_lea.sflag [#allocation3], %s903_s12 }
 0x1e0   : > { %p1016_p7 = pnand %p1019_p4, %p1189_p6 }
 0x1e2   : > { %p1017_p8 = pneg %p1016_p7 }
 0x1e4   : > { %1101 = dma.done.wait (%p1017_p8), %s904_s13, 4096  }
 0x1e5   : > { %1103 = vsyncadd (%p1017_p8), %s904_s13, 4294963200  ;;  %p14_p9 = scmp.ge.s32.totalorder %s1172_s21, 4   ;;  %s1775_s15 = smov %s1110_s16 }
 0x1e6   : > { %s1776_s16 = smov %s1114_s17  ;;  %s1777_s17 = smov %s1183_s24 }
 0x1e7   : > { %s1778_s18 = smov %s1172_s21  ;;  %16 = sbr.rel (!%p14_p9) target bundleno = 3 (0x3), region = 71 }
 0x1ec   :  { %910 = vsyncpa [#allocation3], 1 }
 0x1ed   :  { %912 = vsyncpa [#allocation3 + $0x1], 1 }

</bundles_post_ra>
